<compile_context>
chip_gen: v7x
topology: tpu7x:2x2x1
jax: 0.10.0
libtpu: 0.0.40
codegen_flags: <defaults>
</compile_context>

<pallas_src>
import jax
import jax.numpy as jnp
from jax import lax
from jax.experimental import pallas as pl
from jax.experimental.pallas import tpu as pltpu

EPS = 1e-5


def _fusion_kernel(x1_ref, x2_ref, g1_ref, g2_ref, wfa_ref, wfb_ref, bias_ref, out_ref):
    bt, f, h = x1_ref.shape
    inv_n = 1.0 / float(f * h)

    def layernorm_bf16(x_ref, g_ref):
        x = x_ref[...]                                                     # (Bt, F, H), f32
        # One pass: joint mean and E[x^2] over (F, H) per batch element.
        m = jnp.sum(jnp.sum(x, axis=2, keepdims=True), axis=1, keepdims=True) * inv_n
        ex2 = jnp.sum(jnp.sum(x * x, axis=2, keepdims=True), axis=1, keepdims=True) * inv_n
        inv = lax.rsqrt(ex2 - m * m + EPS)                                  # (Bt, 1, 1)
        xn = (x - m) * inv * g_ref[...]                                     # beta folded into bias_ref
        # Flatten (Bt, F) -> Bt*F rows (F is a multiple of 8, layout-trivial), cast for the MXU.
        return xn.reshape(bt * f, h).astype(jnp.bfloat16)

    a = layernorm_bf16(x1_ref, g1_ref)                                      # (Bt*F, H) bf16
    b = layernorm_bf16(x2_ref, g2_ref)                                      # (Bt*F, H) bf16

    # cat([x1n, x2n], -1) @ Wf.T  ==  x1n @ Wf[:, :H].T + x2n @ Wf[:, H:].T
    acc = jnp.dot(a, wfa_ref[...], preferred_element_type=jnp.float32)      # (Bt*F, F) f32
    acc += jnp.dot(b, wfb_ref[...], preferred_element_type=jnp.float32)
    out = acc.reshape(bt, f, f) + bias_ref[...]                             # (F,F) broadcasts over Bt
    out_ref[...] = out.astype(out_ref.dtype)


def data_fusion_forward(x1, x2, g1, b1, g2, b2, w_fusion, b_fusion):
    """x1, x2: [B, F, H]; g*, b*: [F, H]; w_fusion: [F, 2H]; b_fusion: [F]. H must equal F."""
    B, F, H = x1.shape
    assert x2.shape == (B, F, H)
    assert w_fusion.shape == (F, 2 * H) and H == F, "module requires H == num_features"

    # Split + transpose the fusion weight so the kernel does plain (M,H)@(H,F) matmuls;
    # cast weights to bf16 (accumulation stays f32 inside the kernel).
    wft = w_fusion.T                                   # (2H, F), f32
    wfa = wft[:H].astype(jnp.bfloat16)                 # (H, F)  multiplies x1_norm
    wfb = wft[H:].astype(jnp.bfloat16)                 # (H, F)  multiplies x2_norm

    # Fold the LayerNorm betas into the fusion bias (exact, done in f32 on the host):
    #   (x̂*g + b) @ W  ==  (x̂*g) @ W + b @ W
    bias_eff = (b1 @ wft[:H] + b2 @ wft[H:] + b_fusion[None, :]).astype(jnp.float32)  # (F, F)

    # Batch tile: aim for ~512 MXU rows (Bt*F) per grid step, Bt must divide B.
    target = max(1, 512 // F)
    Bt = 1
    for d in range(1, B + 1):
        if B % d == 0 and d <= target:
            Bt = d
    grid = (B // Bt,)

    # VMEM budget: double-buffered per-step blocks + params, with margin; floor at the
    # 32 MiB default scoped limit, cap below v7x's 64 MiB physical VMEM.
    per_step_bytes = (2 * Bt * F * H + Bt * F * F) * 4            # x1 + x2 + out blocks (f32)
    param_bytes = 2 * F * H * 4 + 2 * H * F * 2 + F * F * 4       # g1,g2 f32; wfa,wfb bf16; bias f32
    vmem_needed = 2 * per_step_bytes + 2 * param_bytes + (2 << 20)
    vmem_limit = int(min(max(vmem_needed, 32 << 20), 48 << 20))

    x_spec = pl.BlockSpec((Bt, F, H), lambda i: (i, 0, 0))
    out_spec = pl.BlockSpec((Bt, F, F), lambda i: (i, 0, 0))
    # Grid-invariant params: constant index map -> Mosaic does not re-DMA them across steps.
    p2d = lambda shape: pl.BlockSpec(shape, lambda i: (0, 0))

    return pl.pallas_call(
        _fusion_kernel,
        out_shape=jax.ShapeDtypeStruct((B, F, F), x1.dtype),
        grid_spec=pltpu.PrefetchScalarGridSpec(
            num_scalar_prefetch=0,
            grid=grid,
            in_specs=[
                x_spec,            # x1
                x_spec,            # x2
                p2d((F, H)),       # gamma1
                p2d((F, H)),       # gamma2
                p2d((H, F)),       # wfa (bf16)
                p2d((H, F)),       # wfb (bf16)
                p2d((F, F)),       # bias_eff (betas + fusion bias folded)
            ],
            out_specs=out_spec,
        ),
        compiler_params=pltpu.CompilerParams(
            dimension_semantics=("parallel",),
            vmem_limit_bytes=vmem_limit),
    )(x1, x2, g1, g2, wfa, wfb, bias_eff)


def reference_forward(x1, x2, g1, b1, g2, b2, w_fusion, b_fusion):
    def layernorm(x, gamma, beta):
        mean = x.mean(axis=(1, 2), keepdims=True)
        var = ((x - mean) ** 2).mean(axis=(1, 2), keepdims=True)
        return (x - mean) / jnp.sqrt(var + EPS) * gamma + beta

    x1n = layernorm(x1, g1, b1)
    x2n = layernorm(x2, g2, b2)
    fused = jnp.concatenate([x1n, x2n], axis=2)
    return fused @ w_fusion.T + b_fusion


if __name__ == "__main__":
    # Small shapes: num_features F = hidden H = 32 (module's hard-coded 768 scaled down;
    # the forward only type-checks when H == num_features).
    B, F = 2, 32
    H = F

    key = jax.random.PRNGKey(0)
    k1, k2, kg1, kb1, kg2, kb2, kw, kb = jax.random.split(key, 8)

    x1 = jax.random.normal(k1, (B, F, H), dtype=jnp.float32)
    x2 = jax.random.normal(k2, (B, F, H), dtype=jnp.float32)

    # Non-trivial affine params so the beta-fold is actually exercised.
    g1 = 1.0 + 0.1 * jax.random.normal(kg1, (F, H), dtype=jnp.float32)
    b1 = 0.1 * jax.random.normal(kb1, (F, H), dtype=jnp.float32)
    g2 = 1.0 + 0.1 * jax.random.normal(kg2, (F, H), dtype=jnp.float32)
    b2 = 0.1 * jax.random.normal(kb2, (F, H), dtype=jnp.float32)

    bound = 1.0 / (2 * F) ** 0.5  # PyTorch Linear(2F, F) default init
    w_fusion = jax.random.uniform(kw, (F, 2 * H), jnp.float32, -bound, bound)
    b_fusion = jax.random.uniform(kb, (F,), jnp.float32, -bound, bound)

    out = data_fusion_forward(x1, x2, g1, b1, g2, b2, w_fusion, b_fusion)
    out = jax.block_until_ready(out)

    ref = reference_forward(x1, x2, g1, b1, g2, b2, w_fusion, b_fusion)
    assert out.shape == (B, F, F)
    # bf16 MXU inputs with f32 accumulation -> relax tolerance vs the pure-f32 reference.
    assert jnp.allclose(out, ref, rtol=2e-2, atol=2e-2), "mismatch vs pure-JAX reference"

    print("KERNEL_OK")
</pallas_src>

<mosaic_0001>
module attributes {stable_mosaic.version = 11 : i64} {
  func.func @_fusion_kernel(%arg0: i32, %arg1: memref<2x32x32xf32, #tpu.memory_space<vmem>>, %arg2: memref<2x32x32xf32, #tpu.memory_space<vmem>>, %arg3: memref<32x32xf32, #tpu.memory_space<vmem>>, %arg4: memref<32x32xf32, #tpu.memory_space<vmem>>, %arg5: memref<32x32xbf16, #tpu.memory_space<vmem>>, %arg6: memref<32x32xbf16, #tpu.memory_space<vmem>>, %arg7: memref<32x32xf32, #tpu.memory_space<vmem>>, %arg8: memref<2x32x32xf32, #tpu.memory_space<vmem>>) attributes {dimension_semantics = [#tpu.dimension_semantics<parallel>], iteration_bounds = array<i64: 1>, scalar_prefetch = 0 : i64, scratch_operands = 0 : i64, tpu.core_type = #tpu.core_type<tc>, window_params = [{transform_indices = @transform_0, window_bounds = array<i64: 2, 32, 32>}, {transform_indices = @transform_1, window_bounds = array<i64: 2, 32, 32>}, {pipeline_mode = #tpu.pipeline_mode<synchronous>, transform_indices = @transform_2, window_bounds = array<i64: 32, 32>}, {pipeline_mode = #tpu.pipeline_mode<synchronous>, transform_indices = @transform_3, window_bounds = array<i64: 32, 32>}, {pipeline_mode = #tpu.pipeline_mode<synchronous>, transform_indices = @transform_4, window_bounds = array<i64: 32, 32>}, {pipeline_mode = #tpu.pipeline_mode<synchronous>, transform_indices = @transform_5, window_bounds = array<i64: 32, 32>}, {pipeline_mode = #tpu.pipeline_mode<synchronous>, transform_indices = @transform_6, window_bounds = array<i64: 32, 32>}, {transform_indices = @transform_7, window_bounds = array<i64: 2, 32, 32>}]} {
    %c0 = arith.constant 0 : index
    %c0_0 = arith.constant 0 : index
    %c0_1 = arith.constant 0 : index
    %0 = vector.load %arg1[%c0, %c0_0, %c0_1] : memref<2x32x32xf32, #tpu.memory_space<vmem>>, vector<2x32x32xf32>
    %cst = arith.constant dense<0.000000e+00> : vector<2x32xf32>
    %1 = vector.multi_reduction <add>, %0, %cst [2] : vector<2x32x32xf32> to vector<2x32xf32>
    %2 = vector.shape_cast %1 : vector<2x32xf32> to vector<2x32x1xf32>
    %cst_2 = arith.constant dense<0.000000e+00> : vector<2x1xf32>
    %3 = vector.multi_reduction <add>, %2, %cst_2 [1] : vector<2x32x1xf32> to vector<2x1xf32>
    %4 = vector.shape_cast %3 : vector<2x1xf32> to vector<2x1x1xf32>
    %cst_3 = arith.constant 9.765625E-4 : f32
    %5 = vector.broadcast %cst_3 : f32 to vector<2x1x1xf32>
    %6 = arith.mulf %4, %5 : vector<2x1x1xf32>
    %7 = arith.mulf %0, %0 : vector<2x32x32xf32>
    %cst_4 = arith.constant dense<0.000000e+00> : vector<2x32xf32>
    %8 = vector.multi_reduction <add>, %7, %cst_4 [2] : vector<2x32x32xf32> to vector<2x32xf32>
    %9 = vector.shape_cast %8 : vector<2x32xf32> to vector<2x32x1xf32>
    %cst_5 = arith.constant dense<0.000000e+00> : vector<2x1xf32>
    %10 = vector.multi_reduction <add>, %9, %cst_5 [1] : vector<2x32x1xf32> to vector<2x1xf32>
    %11 = vector.shape_cast %10 : vector<2x1xf32> to vector<2x1x1xf32>
    %cst_6 = arith.constant 9.765625E-4 : f32
    %12 = vector.broadcast %cst_6 : f32 to vector<2x1x1xf32>
    %13 = arith.mulf %11, %12 : vector<2x1x1xf32>
    %14 = arith.mulf %6, %6 : vector<2x1x1xf32>
    %15 = arith.subf %13, %14 : vector<2x1x1xf32>
    %cst_7 = arith.constant 9.99999974E-6 : f32
    %16 = vector.broadcast %cst_7 : f32 to vector<2x1x1xf32>
    %17 = arith.addf %15, %16 : vector<2x1x1xf32>
    %18 = math.rsqrt %17 : vector<2x1x1xf32>
    %19 = vector.broadcast %6 : vector<2x1x1xf32> to vector<2x32x32xf32>
    %20 = arith.subf %0, %19 : vector<2x32x32xf32>
    %21 = vector.broadcast %18 : vector<2x1x1xf32> to vector<2x32x32xf32>
    %22 = arith.mulf %20, %21 : vector<2x32x32xf32>
    %c0_8 = arith.constant 0 : index
    %c0_9 = arith.constant 0 : index
    %23 = vector.load %arg3[%c0_8, %c0_9] : memref<32x32xf32, #tpu.memory_space<vmem>>, vector<32x32xf32>
    %24 = vector.shape_cast %23 : vector<32x32xf32> to vector<1x32x32xf32>
    %25 = vector.broadcast %24 : vector<1x32x32xf32> to vector<2x32x32xf32>
    %26 = arith.mulf %22, %25 : vector<2x32x32xf32>
    %27 = vector.shape_cast %26 : vector<2x32x32xf32> to vector<64x32xf32>
    %28 = arith.truncf %27 : vector<64x32xf32> to vector<64x32xbf16>
    %c0_10 = arith.constant 0 : index
    %c0_11 = arith.constant 0 : index
    %c0_12 = arith.constant 0 : index
    %29 = vector.load %arg2[%c0_10, %c0_11, %c0_12] : memref<2x32x32xf32, #tpu.memory_space<vmem>>, vector<2x32x32xf32>
    %cst_13 = arith.constant dense<0.000000e+00> : vector<2x32xf32>
    %30 = vector.multi_reduction <add>, %29, %cst_13 [2] : vector<2x32x32xf32> to vector<2x32xf32>
    %31 = vector.shape_cast %30 : vector<2x32xf32> to vector<2x32x1xf32>
    %cst_14 = arith.constant dense<0.000000e+00> : vector<2x1xf32>
    %32 = vector.multi_reduction <add>, %31, %cst_14 [1] : vector<2x32x1xf32> to vector<2x1xf32>
    %33 = vector.shape_cast %32 : vector<2x1xf32> to vector<2x1x1xf32>
    %cst_15 = arith.constant 9.765625E-4 : f32
    %34 = vector.broadcast %cst_15 : f32 to vector<2x1x1xf32>
    %35 = arith.mulf %33, %34 : vector<2x1x1xf32>
    %36 = arith.mulf %29, %29 : vector<2x32x32xf32>
    %cst_16 = arith.constant dense<0.000000e+00> : vector<2x32xf32>
    %37 = vector.multi_reduction <add>, %36, %cst_16 [2] : vector<2x32x32xf32> to vector<2x32xf32>
    %38 = vector.shape_cast %37 : vector<2x32xf32> to vector<2x32x1xf32>
    %cst_17 = arith.constant dense<0.000000e+00> : vector<2x1xf32>
    %39 = vector.multi_reduction <add>, %38, %cst_17 [1] : vector<2x32x1xf32> to vector<2x1xf32>
    %40 = vector.shape_cast %39 : vector<2x1xf32> to vector<2x1x1xf32>
    %cst_18 = arith.constant 9.765625E-4 : f32
    %41 = vector.broadcast %cst_18 : f32 to vector<2x1x1xf32>
    %42 = arith.mulf %40, %41 : vector<2x1x1xf32>
    %43 = arith.mulf %35, %35 : vector<2x1x1xf32>
    %44 = arith.subf %42, %43 : vector<2x1x1xf32>
    %cst_19 = arith.constant 9.99999974E-6 : f32
    %45 = vector.broadcast %cst_19 : f32 to vector<2x1x1xf32>
    %46 = arith.addf %44, %45 : vector<2x1x1xf32>
    %47 = math.rsqrt %46 : vector<2x1x1xf32>
    %48 = vector.broadcast %35 : vector<2x1x1xf32> to vector<2x32x32xf32>
    %49 = arith.subf %29, %48 : vector<2x32x32xf32>
    %50 = vector.broadcast %47 : vector<2x1x1xf32> to vector<2x32x32xf32>
    %51 = arith.mulf %49, %50 : vector<2x32x32xf32>
    %c0_20 = arith.constant 0 : index
    %c0_21 = arith.constant 0 : index
    %52 = vector.load %arg4[%c0_20, %c0_21] : memref<32x32xf32, #tpu.memory_space<vmem>>, vector<32x32xf32>
    %53 = vector.shape_cast %52 : vector<32x32xf32> to vector<1x32x32xf32>
    %54 = vector.broadcast %53 : vector<1x32x32xf32> to vector<2x32x32xf32>
    %55 = arith.mulf %51, %54 : vector<2x32x32xf32>
    %56 = vector.shape_cast %55 : vector<2x32x32xf32> to vector<64x32xf32>
    %57 = arith.truncf %56 : vector<64x32xf32> to vector<64x32xbf16>
    %c0_22 = arith.constant 0 : index
    %c0_23 = arith.constant 0 : index
    %58 = vector.load %arg5[%c0_22, %c0_23] : memref<32x32xbf16, #tpu.memory_space<vmem>>, vector<32x32xbf16>
    %cst_24 = arith.constant dense<0.000000e+00> : vector<64x32xf32>
    %59 = tpu.matmul %28, %58, %cst_24 {dimension_numbers = #tpu.dot_dimension_numbers<[1], [0], [0], [1], [0, 0, 1, 1], [], []>} : vector<64x32xbf16>, vector<32x32xbf16>, vector<64x32xf32> -> vector<64x32xf32>
    %c0_25 = arith.constant 0 : index
    %c0_26 = arith.constant 0 : index
    %60 = vector.load %arg6[%c0_25, %c0_26] : memref<32x32xbf16, #tpu.memory_space<vmem>>, vector<32x32xbf16>
    %cst_27 = arith.constant dense<0.000000e+00> : vector<64x32xf32>
    %61 = tpu.matmul %57, %60, %cst_27 {dimension_numbers = #tpu.dot_dimension_numbers<[1], [0], [0], [1], [0, 0, 1, 1], [], []>} : vector<64x32xbf16>, vector<32x32xbf16>, vector<64x32xf32> -> vector<64x32xf32>
    %62 = arith.addf %59, %61 : vector<64x32xf32>
    %63 = vector.shape_cast %62 : vector<64x32xf32> to vector<2x32x32xf32>
    %c0_28 = arith.constant 0 : index
    %c0_29 = arith.constant 0 : index
    %64 = vector.load %arg7[%c0_28, %c0_29] : memref<32x32xf32, #tpu.memory_space<vmem>>, vector<32x32xf32>
    %65 = vector.shape_cast %64 : vector<32x32xf32> to vector<1x32x32xf32>
    %66 = vector.broadcast %65 : vector<1x32x32xf32> to vector<2x32x32xf32>
    %67 = arith.addf %63, %66 : vector<2x32x32xf32>
    %c0_30 = arith.constant 0 : index
    %c0_31 = arith.constant 0 : index
    %c0_32 = arith.constant 0 : index
    %68 = vector.load %arg8[%c0_30, %c0_31, %c0_32] : memref<2x32x32xf32, #tpu.memory_space<vmem>>, vector<2x32x32xf32>
    tpu.vector_store %arg8[%c0_30, %c0_31, %c0_32], %67 {strides = array<i32>} : memref<2x32x32xf32, #tpu.memory_space<vmem>>, vector<2x32x32xf32>,
    return
  }
  func.func @transform_0(%arg0: i32) -> (i32, i32, i32) {
    %c0_i32 = arith.constant 0 : i32
    %c0_i32_0 = arith.constant 0 : i32
    %c0_i32_1 = arith.constant 0 : i32
    return %arg0, %c0_i32, %c0_i32_0 : i32, i32, i32
  }
  func.func @transform_1(%arg0: i32) -> (i32, i32, i32) {
    %c0_i32 = arith.constant 0 : i32
    %c0_i32_0 = arith.constant 0 : i32
    %c0_i32_1 = arith.constant 0 : i32
    return %arg0, %c0_i32, %c0_i32_0 : i32, i32, i32
  }
  func.func @transform_2(%arg0: i32) -> (i32, i32) {
    %c0_i32 = arith.constant 0 : i32
    %c0_i32_0 = arith.constant 0 : i32
    %c0_i32_1 = arith.constant 0 : i32
    return %c0_i32, %c0_i32_0 : i32, i32
  }
  func.func @transform_3(%arg0: i32) -> (i32, i32) {
    %c0_i32 = arith.constant 0 : i32
    %c0_i32_0 = arith.constant 0 : i32
    %c0_i32_1 = arith.constant 0 : i32
    return %c0_i32, %c0_i32_0 : i32, i32
  }
  func.func @transform_4(%arg0: i32) -> (i32, i32) {
    %c0_i32 = arith.constant 0 : i32
    %c0_i32_0 = arith.constant 0 : i32
    %c0_i32_1 = arith.constant 0 : i32
    return %c0_i32, %c0_i32_0 : i32, i32
  }
  func.func @transform_5(%arg0: i32) -> (i32, i32) {
    %c0_i32 = arith.constant 0 : i32
    %c0_i32_0 = arith.constant 0 : i32
    %c0_i32_1 = arith.constant 0 : i32
    return %c0_i32, %c0_i32_0 : i32, i32
  }
  func.func @transform_6(%arg0: i32) -> (i32, i32) {
    %c0_i32 = arith.constant 0 : i32
    %c0_i32_0 = arith.constant 0 : i32
    %c0_i32_1 = arith.constant 0 : i32
    return %c0_i32, %c0_i32_0 : i32, i32
  }
  func.func @transform_7(%arg0: i32) -> (i32, i32, i32) {
    %c0_i32 = arith.constant 0 : i32
    %c0_i32_0 = arith.constant 0 : i32
    %c0_i32_1 = arith.constant 0 : i32
    return %arg0, %c0_i32, %c0_i32_0 : i32, i32, i32
  }
}

</mosaic_0001>

<bundles_post_ra>
// kernel: tpu_custom_call.1
= control target key start
LH: loop header
LB: loop body
LE: loop exit
PB: predicated region body
PF: predicated region fallthrough
CT: control target
= control target key end

     0   :  { %12 = vsyncpa [#allocation3], 0  ;;  %s1217_s0 = inlined_call_operand.hbm [shape: f32[2,32,32], index: 0, kind: input, shape index: {}]   ;;  %s1218_s1 = inlined_call_operand.hbm [shape: f32[2,32,32], index: 1, kind: input, shape index: {}]   ;;  %s1219_s2 = inlined_call_operand.hbm [shape: f32[32,32], index: 2, kind: input, shape index: {}]   ;;  %s1220_s3 = inlined_call_operand.hbm [shape: f32[32,32], index: 3, kind: input, shape index: {}]   ;;  %s1221_s4 = inlined_call_operand.hbm [shape: bf16[32,32], index: 4, kind: input, shape index: {}]   ;;  %s1222_s5 = inlined_call_operand.vmem [shape: bf16[32,32], index: 5, kind: input, shape index: {}]   ;;  %s1223_s6 = inlined_call_operand.hbm [shape: f32[32,32], index: 6, kind: input, shape index: {}]   ;;  %s1224_s7 = inlined_call_operand.hbm [shape: f32[2,32,32], index: 7, kind: output, shape index: {}]  }
   0x1   :  { %13 = vsyncpa [#allocation6], 0 }
   0x2   :  { %14 = vsyncpa [#allocation9], 0 }
   0x3   :  { %15 = vsyncpa [#allocation12], 0 }
   0x4   :  { %16 = vsyncpa [#allocation4], 0  ;;  %s868_s24 = smov [#allocation5]   ;;  %s869_s26 = smov [#allocation8]  }
   0x5   :  { %s34_s25 = sshll.u32 %s868_s24, 4  ;;  %s58_s27 = sshll.u32 %s869_s26, 4  ;;  %s35_s25 = int_to_ptr.vmem [resolvable:$true] %s34_s25  ;;  %s919_s27 = int_to_ptr.vmem [resolvable:$true] %s58_s27 }
   0x6   :  { %s704_s30 = scalar_lea.hbm %s1218_s1, 1024 }
   0x7   :  { %p705_p0 = scmp.ne.s32.totalorder %s1218_s1, %s704_s30  ;;  %p708_p1 = scmp.lt.u32.totalorder %s704_s30, %s1218_s1 }
   0x9   :  { %p710_p2 = pnand %p708_p1, %p705_p0 }
   0xb   :  { %713 = shalt.err (!%p710_p2)
}
   0xc   :  { %s714_s12 = scalar_lea.vmem %s35_s25, 1024  ;;  %p719_p4 = scmp.lt.s32.totalorder %s35_s25, %s35_s25 }
   0xd   :  { %p715_p3 = scmp.ne.s32.totalorder %s35_s25, %s714_s12  ;;  %p720_p5 = scmp.lt.s32.totalorder %s714_s12, %s714_s12 }
   0xf   :  { %p721_p6 = por %p720_p5, %p719_p4 }
  0x11   :  { %p722_p7 = pnand %p721_p6, %p715_p3 }
  0x13   :  { %725 = shalt.err (!%p722_p7)
}
  0x14   :  { %s870_s13 = smov 128   ;;  %s871_s14 = smov 8  }
  0x15   :  { %40 = dma.hbm_to_vmem [thread:$0]  %s1218_s1, 1024, %s35_s25, [#allocation6], %s870_s13, %s870_s13, %s871_s14  }
  0x16   :  { %s726_s19 = scalar_lea.hbm %s1220_s3, 512 }
  0x17   :  { %p727_p8 = scmp.ne.s32.totalorder %s1220_s3, %s726_s19  ;;  %p730_p9 = scmp.lt.u32.totalorder %s726_s19, %s1220_s3 }
  0x19   :  { %p732_p10 = pnand %p730_p9, %p727_p8 }
  0x1b   :  { %735 = shalt.err (!%p732_p10)
}
  0x1c   :  { %s736_s24 = scalar_lea.vmem %s919_s27, 512  ;;  %p741_p12 = scmp.lt.s32.totalorder %s919_s27, %s919_s27 }
  0x1d   :  { %p737_p11 = scmp.ne.s32.totalorder %s919_s27, %s736_s24  ;;  %p742_p13 = scmp.lt.s32.totalorder %s736_s24, %s736_s24 }
  0x1f   :  { %p743_p0 = por %p742_p13, %p741_p12 }
  0x21   :  { %p744_p1 = pnand %p743_p0, %p737_p11 }
  0x23   :  { %747 = shalt.err (!%p744_p1)
}
  0x24   :  { %64 = dma.hbm_to_vmem [thread:$0]  %s1220_s3, 512, %s919_s27, [#allocation9], %s870_s13, %s870_s13, %s871_s14  }
  0x25   :  { %s872_s26 = smov [#allocation2]   ;;  %s873_s29 = smov [#allocation7]  }
  0x26   :  { %s22_s28 = sshll.u32 %s872_s26, 4  ;;  %s46_s30 = sshll.u32 %s873_s29, 4  ;;  %s23_s28 = int_to_ptr.vmem [resolvable:$true] %s22_s28  ;;  %s956_s30 = int_to_ptr.vmem [resolvable:$true] %s46_s30 }
  0x27   :  { %s748_s10 = scalar_lea.hbm %s1217_s0, 1024 }
  0x28   :  { %p749_p2 = scmp.ne.s32.totalorder %s1217_s0, %s748_s10  ;;  %p752_p3 = scmp.lt.u32.totalorder %s748_s10, %s1217_s0 }
  0x2a   :  { %p754_p4 = pnand %p752_p3, %p749_p2 }
  0x2c   :  { %757 = shalt.err (!%p754_p4)
}
  0x2d   :  { %s758_s3 = scalar_lea.vmem %s23_s28, 1024  ;;  %p763_p6 = scmp.lt.s32.totalorder %s23_s28, %s23_s28 }
  0x2e   :  { %p759_p5 = scmp.ne.s32.totalorder %s23_s28, %s758_s3  ;;  %p764_p7 = scmp.lt.s32.totalorder %s758_s3, %s758_s3 }
  0x30   :  { %p765_p8 = por %p764_p7, %p763_p6 }
  0x32   :  { %p766_p9 = pnand %p765_p8, %p759_p5 }
  0x34   :  { %769 = shalt.err (!%p766_p9)
}
  0x35   :  { %28 = dma.hbm_to_vmem [thread:$0]  %s1217_s0, 1024, %s23_s28, [#allocation3], %s870_s13, %s870_s13, %s871_s14  }
  0x36   :  { %s770_s20 = scalar_lea.hbm %s1219_s2, 512 }
  0x37   :  { %p771_p10 = scmp.ne.s32.totalorder %s1219_s2, %s770_s20  ;;  %p774_p11 = scmp.lt.u32.totalorder %s770_s20, %s1219_s2 }
  0x39   :  { %p776_p12 = pnand %p774_p11, %p771_p10 }
  0x3b   :  { %779 = shalt.err (!%p776_p12)
}
  0x3c   :  { %s780_s1 = scalar_lea.vmem %s956_s30, 512  ;;  %p785_p0 = scmp.lt.s32.totalorder %s956_s30, %s956_s30 }
  0x3d   :  { %p781_p13 = scmp.ne.s32.totalorder %s956_s30, %s780_s1  ;;  %p786_p1 = scmp.lt.s32.totalorder %s780_s1, %s780_s1 }
  0x3f   :  { %p787_p2 = por %p786_p1, %p785_p0 }
  0x41   :  { %p788_p3 = pnand %p787_p2, %p781_p13 }
  0x43   :  { %791 = shalt.err (!%p788_p3)
}
  0x44   :  { %52 = dma.hbm_to_vmem [thread:$0]  %s1219_s2, 512, %s956_s30, [#allocation6], %s870_s13, %s870_s13, %s871_s14  }
  0x45   :  { %s874_s26 = smov [#allocation10]   ;;  %s792_s9 = scalar_lea.hbm %s1221_s4, 256 }
  0x46   :  { %s70_s28 = sshll.u32 %s874_s26, 4  ;;  %p793_p4 = scmp.ne.s32.totalorder %s1221_s4, %s792_s9  ;;  %s71_s28 = int_to_ptr.vmem [resolvable:$true] %s70_s28 }
  0x47   :  { %p796_p5 = scmp.lt.u32.totalorder %s792_s9, %s1221_s4 }
  0x49   :  { %p798_p6 = pnand %p796_p5, %p793_p4 }
  0x4b   :  { %801 = shalt.err (!%p798_p6)
}
  0x4c   :  { %s802_s16 = scalar_lea.vmem %s71_s28, 256  ;;  %p807_p8 = scmp.lt.s32.totalorder %s71_s28, %s71_s28 }
  0x4d   :  { %p803_p7 = scmp.ne.s32.totalorder %s71_s28, %s802_s16  ;;  %p808_p9 = scmp.lt.s32.totalorder %s802_s16, %s802_s16 }
  0x4f   :  { %p809_p10 = por %p808_p9, %p807_p8 }
  0x51   :  { %p810_p11 = pnand %p809_p10, %p803_p7 }
  0x53   :  { %813 = shalt.err (!%p810_p11)
}
  0x54   :  { %s875_s2 = smov 64   ;;  %s876_s30 = smov 4  }
  0x55   :  { %76 = dma.hbm_to_vmem [thread:$0]  %s1221_s4, 256, %s71_s28, [#allocation9], %s875_s2, %s875_s2, %s876_s30  }
  0x56   :  { %s877_s17 = smov [#allocation11]   ;;  %s814_s21 = scalar_lea.hbm %s1223_s6, 512 }
  0x57   :  { %s84_s18 = sshll.u32 %s877_s17, 4  ;;  %p815_p12 = scmp.ne.s32.totalorder %s1223_s6, %s814_s21  ;;  %s85_s18 = int_to_ptr.vmem [resolvable:$true] %s84_s18 }
  0x58   :  { %p818_p13 = scmp.lt.u32.totalorder %s814_s21, %s1223_s6 }
  0x5a   :  { %p820_p0 = pnand %p818_p13, %p815_p12 }
  0x5c   :  { %823 = shalt.err (!%p820_p0)
}
  0x5d   :  { %s824_s0 = scalar_lea.vmem %s85_s18, 512  ;;  %p829_p2 = scmp.lt.s32.totalorder %s85_s18, %s85_s18 }
  0x5e   :  { %p825_p1 = scmp.ne.s32.totalorder %s85_s18, %s824_s0  ;;  %p830_p3 = scmp.lt.s32.totalorder %s824_s0, %s824_s0 }
  0x60   :  { %p831_p4 = por %p830_p3, %p829_p2 }
  0x62   :  { %p832_p5 = pnand %p831_p4, %p825_p1 }
  0x64   :  { %835 = shalt.err (!%p832_p5)
}
  0x65   :  { %90 = dma.hbm_to_vmem [thread:$0]  %s1223_s6, 512, %s85_s18, [#allocation12], %s870_s13, %s870_s13, %s871_s14  }
  0x66   :  { %858 = dma.done.wait [#allocation3], 1024  }
  0x67   :  { %859 = vsyncadd [#allocation3], 4294966272 }
  0x68   :  { %860 = dma.done.wait [#allocation6], 1536  }
  0x69   :  { %861 = vsyncadd [#allocation6], 4294965760 }
  0x6a   :  { %862 = dma.done.wait [#allocation9], 768  }
  0x6b   :  { %863 = vsyncadd [#allocation9], 4294966528 }
  0x6c   :  { %864 = dma.done.wait [#allocation12], 512  }
  0x6d   :  { %865 = vsyncadd [#allocation12], 4294966784  ;;  %vm118_vm0 = vcmask 261120   ;;  %v1020_v0 = vld [vmem:[#allocation5] sm:$0xff]  ;;  %v1024_v2 = vld [vmem:[#allocation5 + $0x8] sm:$0xff] }
  0x6e   :  { %v1022_v1 = vld [vmem:[#allocation2] sm:$0xff]  ;;  %v263_v3 = vsel %vm118_vm0, %v1020_v0, 0.0  ;;  %v1030_v5 = vld [vmem:[#allocation2 + $0x8] sm:$0xff]  ;;  %v266_v6 = vsel %vm118_vm0, %v1024_v2, 0.0  ;;  %v1038_v9 = vld [vmem:[#allocation2 + $0x10] sm:$0xff]  ;;  %v308_v16 = vmul.f32 %v1024_v2, %v1024_v2  ;;  %v307_v17 = vmul.f32 %v1020_v0, %v1020_v0 }
  0x6f   :  { %v119_v4 = vsel %vm118_vm0, %v1022_v1, 0.0  ;;  %264 = vadd.xlane.f32.xlu1 %v263_v3  ;;  %v122_v7 = vsel %vm118_vm0, %v1030_v5, 0.0  ;;  %v163_v8 = vmul.f32 %v1022_v1, %v1022_v1  ;;  %v125_v11 = vsel %vm118_vm0, %v1038_v9, 0.0  ;;  %v1045_v13 = vld [vmem:[#allocation5 + $0x10] sm:$0xff]  ;;  %v1058_v21 = vld [vmem:[#allocation2 + $0x18] sm:$0xff]  ;;  %v1076_v32 = vld [vmem:[#allocation2 + $0x28] sm:$0xff] }
  0x70   :  { %120 = vadd.xlane.f32.xlu0 %v119_v4  ;;  %v164_v12 = vmul.f32 %v1030_v5, %v1030_v5  ;;  %v269_v14 = vsel %vm118_vm0, %v1045_v13, 0.0  ;;  %v318_v18 = vsel %vm118_vm0, %v308_v16, 0.0  ;;  %v315_v19 = vsel %vm118_vm0, %v307_v17, 0.0  ;;  %v1065_v25 = vld [vmem:[#allocation5 + $0x18] sm:$0xff]  ;;  %v1078_v33 = vld [vmem:[#allocation2 + $0x20] sm:$0xff]  ;;  %v1084_v36 = vld [vmem:[#allocation5 + $0x28] sm:$0xff] }
  0x71   :  { %v171_v10 = vsel %vm118_vm0, %v163_v8, 0.0  ;;  %v165_v20 = vmul.f32 %v1038_v9, %v1038_v9  ;;  %v128_v23 = vsel %vm118_vm0, %v1058_v21, 0.0  ;;  %v309_v24 = vmul.f32 %v1045_v13, %v1045_v13  ;;  %v1086_v37 = vld [vmem:[#allocation5 + $0x20] sm:$0xff]  ;;  %v1094_v41 = vld [vmem:[#allocation2 + $0x30] sm:$0xff]  ;;  %v1114_v53 = vld [vmem:[#allocation2 + $0x38] sm:$0xff] }
  0x72   :  { %v174_v15 = vsel %vm118_vm0, %v164_v12, 0.0  ;;  %v272_v27 = vsel %vm118_vm0, %v1065_v25, 0.0  ;;  %v310_v28 = vmul.f32 %v1065_v25, %v1065_v25  ;;  %v166_v29 = vmul.f32 %v1058_v21, %v1058_v21  ;;  %v1101_v45 = vld [vmem:[#allocation5 + $0x30] sm:$0xff]  ;;  %v1121_v57 = vld [vmem:[#allocation5 + $0x38] sm:$0xff]  ;;  %v692_v3 = vld [vmem:[%s1222_s5] sm:$0xff]  }
  0x73   :  { %267 = vadd.xlane.f32.xlu1 %v266_v6  ;;  %v177_v22 = vsel %vm118_vm0, %v165_v20, 0.0  ;;  %v321_v26 = vsel %vm118_vm0, %v309_v24, 0.0  ;;  %v134_v34 = vsel %vm118_vm0, %v1076_v32, 0.0  ;;  %v131_v35 = vsel %vm118_vm0, %v1078_v33, 0.0  ;;  %v693_v4 = vld [vmem:[#allocation10] sm:$0xff]   ;;  %649 = vmatprep.subr.bf16.mxu1 %v692_v3  ;;  %v694_v6 = vld [vmem:[%s1222_s5 + $0x8] sm:$0xff]  }
  0x74   :  { %123 = vadd.xlane.f32.xlu0 %v122_v7  ;;  %v324_v30 = vsel %vm118_vm0, %v310_v28, 0.0  ;;  %v180_v31 = vsel %vm118_vm0, %v166_v29, 0.0  ;;  %v278_v38 = vsel %vm118_vm0, %v1084_v36, 0.0  ;;  %v275_v39 = vsel %vm118_vm0, %v1086_v37, 0.0  ;;  %661 = vmatprep.subr.bf16.mxu0 %v693_v4  ;;  %v695_v7 = vld [vmem:[#allocation10 + $0x8] sm:$0xff]   ;;  %s878_s5 = smov [#allocation13]  }
  0x75   :  { %v167_v40 = vmul.f32 %v1078_v33, %v1078_v33  ;;  %v137_v43 = vsel %vm118_vm0, %v1094_v41, 0.0  ;;  %v168_v44 = vmul.f32 %v1076_v32, %v1076_v32  ;;  %v281_v46 = vsel %vm118_vm0, %v1101_v45, 0.0  ;;  %650 = vmatpush3.bf16.msra.mxu1 %v692_v3  ;;  %662 = vmatpush3.bf16.msra.mxu0 %v693_v4  ;;  %s610_s8 = sshll.u32 %s878_s5, 4  ;;  %s611_s8 = int_to_ptr.vmem [resolvable:$true] %s610_s8 }
  0x76   :  { %v312_v48 = vmul.f32 %v1084_v36, %v1084_v36  ;;  %v311_v49 = vmul.f32 %v1086_v37, %v1086_v37  ;;  %v169_v52 = vmul.f32 %v1094_v41, %v1094_v41  ;;  %v140_v55 = vsel %vm118_vm0, %v1114_v53, 0.0  ;;  %651 = vmatprep.subr.bf16.mxu1 %v694_v6  ;;  %663 = vmatprep.subr.bf16.mxu0 %v695_v7  ;;  %s836_s9 = scalar_lea.vmem %s611_s8, 1024  ;;  %p841_p7 = scmp.lt.s32.totalorder %s611_s8, %s611_s8 }
  0x77   :  { %172 = vadd.xlane.f32.xlu1 %v171_v10  ;;  %v183_v42 = vsel %vm118_vm0, %v167_v40, 0.0  ;;  %v186_v47 = vsel %vm118_vm0, %v168_v44, 0.0  ;;  %v313_v56 = vmul.f32 %v1101_v45, %v1101_v45  ;;  %v284_v59 = vsel %vm118_vm0, %v1121_v57, 0.0  ;;  %p837_p6 = scmp.ne.s32.totalorder %s611_s8, %s836_s9  ;;  %p842_p8 = scmp.lt.s32.totalorder %s836_s9, %s836_s9 }
  0x78   :  { %126 = vadd.xlane.f32.xlu0 %v125_v11  ;;  %v330_v50 = vsel %vm118_vm0, %v312_v48, 0.0  ;;  %v327_v51 = vsel %vm118_vm0, %v311_v49, 0.0  ;;  %v189_v54 = vsel %vm118_vm0, %v169_v52, 0.0  ;;  %v314_v60 = vmul.f32 %v1121_v57, %v1121_v57 }
  0x79   :  { %v333_v58 = vsel %vm118_vm0, %v313_v56, 0.0  ;;  %v170_v61 = vmul.f32 %v1114_v53, %v1114_v53  ;;  %652 = vmatpush3.bf16.msra.mxu1 %v694_v6  ;;  %664 = vmatpush3.bf16.msra.mxu0 %v695_v7  ;;  %p843_p9 = por %p842_p8, %p841_p7 }
  0x7a   :  { %v336_v62 = vsel %vm118_vm0, %v314_v60, 0.0 }
  0x7b   :  { %270 = vadd.xlane.f32.xlu1 %v269_v14  ;;  %v192_v63 = vsel %vm118_vm0, %v170_v61, 0.0  ;;  %p844_p10 = pnand %p843_p9, %p837_p6 }
  0x7c   :  { %175 = vadd.xlane.f32.xlu0 %v174_v15 }
  0x7f   :  { %319 = vadd.xlane.f32.xlu1 %v318_v18 }
  0x80   :  { %316 = vadd.xlane.f32.xlu0 %v315_v19 }
  0x83   :  { %178 = vadd.xlane.f32.xlu1 %v177_v22 }
  0x84   :  { %129 = vadd.xlane.f32.xlu0 %v128_v23 }
  0x87   :  { %322 = vadd.xlane.f32.xlu1 %v321_v26 }
  0x88   :  { %273 = vadd.xlane.f32.xlu0 %v272_v27 }
  0x8b   :  { %325 = vadd.xlane.f32.xlu1 %v324_v30 }
  0x8c   :  { %181 = vadd.xlane.f32.xlu0 %v180_v31 }
  0x8f   :  { %135 = vadd.xlane.f32.xlu1 %v134_v34 }
  0x90   :  { %132 = vadd.xlane.f32.xlu0 %v131_v35 }
  0x93   :  { %279 = vadd.xlane.f32.xlu1 %v278_v38 }
  0x94   :  { %276 = vadd.xlane.f32.xlu0 %v275_v39 }
  0x97   :  { %184 = vadd.xlane.f32.xlu1 %v183_v42 }
  0x98   :  { %138 = vadd.xlane.f32.xlu0 %v137_v43 }
  0x9b   :  { %282 = vadd.xlane.f32.xlu1 %v281_v46 }
  0x9c   :  { %187 = vadd.xlane.f32.xlu0 %v186_v47 }
  0x9f   :  { %331 = vadd.xlane.f32.xlu1 %v330_v50 }
  0xa0   :  { %328 = vadd.xlane.f32.xlu0 %v327_v51 }
  0xa3   :  { %190 = vadd.xlane.f32.xlu1 %v189_v54 }
  0xa4   :  { %141 = vadd.xlane.f32.xlu0 %v140_v55 }
  0xa7   :  { %334 = vadd.xlane.f32.xlu1 %v333_v58 }
  0xa8   :  { %285 = vadd.xlane.f32.xlu0 %v284_v59 }
  0xab   :  { %337 = vadd.xlane.f32.xlu1 %v336_v62 }
  0xac   :  { %193 = vadd.xlane.f32.xlu0 %v192_v63 }
  0xfc   :  { %v265_v8 = vpop.xlane.xlu1 %264 }
  0xfd   :  { %v121_v10 = vpop.xlane.xlu0 %120 }
 0x100   :  { %v268_v11 = vpop.xlane.xlu1 %267 }
 0x101   :  { %v124_v12 = vpop.xlane.xlu0 %123  ;;  %v287_v26 = vadd.f32 %v268_v11, %v265_v8 }
 0x102   :  { %v143_v20 = vadd.f32 %v124_v12, %v121_v10 }
 0x104   :  { %v173_v14 = vpop.xlane.xlu1 %172 }
 0x105   :  { %v127_v15 = vpop.xlane.xlu0 %126 }
 0x106   :  { %v144_v22 = vadd.f32 %v143_v20, %v127_v15 }
 0x108   :  { %v271_v16 = vpop.xlane.xlu1 %270 }
 0x109   :  { %v176_v17 = vpop.xlane.xlu0 %175  ;;  %v288_v28 = vadd.f32 %v287_v26, %v271_v16 }
 0x10a   :  { %v195_v34 = vadd.f32 %v176_v17, %v173_v14 }
 0x10c   :  { %v320_v18 = vpop.xlane.xlu1 %319 }
 0x10d   :  { %v317_v19 = vpop.xlane.xlu0 %316 }
 0x10e   :  { %v339_v35 = vadd.f32 %v320_v18, %v317_v19 }
 0x110   :  { %v179_v23 = vpop.xlane.xlu1 %178 }
 0x111   :  { %v130_v24 = vpop.xlane.xlu0 %129  ;;  %v196_v40 = vadd.f32 %v195_v34, %v179_v23 }
 0x112   :  { %v145_v27 = vadd.f32 %v144_v22, %v130_v24 }
 0x114   :  { %v146_v29 = vrot.slane %v145_v27, 4  ;;  %v323_v30 = vpop.xlane.xlu1 %322 }
 0x115   :  { %v274_v31 = vpop.xlane.xlu0 %273  ;;  %v340_v43 = vadd.f32 %v339_v35, %v323_v30 }
 0x116   :  { %v147_v38 = vadd.f32 %v146_v29, %v145_v27  ;;  %v289_v39 = vadd.f32 %v288_v28, %v274_v31 }
 0x118   :  { %v148_v42 = vrot.slane %v147_v38, 2  ;;  %v290_v44 = vrot.slane %v289_v39, 4  ;;  %v326_v46 = vpop.xlane.xlu1 %325 }
 0x119   :  { %v182_v47 = vpop.xlane.xlu0 %181  ;;  %v341_v50 = vadd.f32 %v340_v43, %v326_v46 }
 0x11a   :  { %v149_v48 = vadd.f32 %v148_v42, %v147_v38  ;;  %v291_v49 = vadd.f32 %v290_v44, %v289_v39  ;;  %v197_v51 = vadd.f32 %v196_v40, %v182_v47 }
 0x11b   :  { %v342_v55 = vrot.slane %v341_v50, 4 }
 0x11c   :  { %v150_v52 = vrot.slane %v149_v48, 1  ;;  %v292_v54 = vrot.slane %v291_v49, 2  ;;  %v198_v56 = vrot.slane %v197_v51, 4  ;;  %v136_v58 = vpop.xlane.xlu1 %135 }
 0x11d   :  { %v133_v59 = vpop.xlane.xlu0 %132  ;;  %v343_v61 = vadd.f32 %v342_v55, %v341_v50 }
 0x11e   :  { %v293_v60 = vadd.f32 %v292_v54, %v291_v49  ;;  %v199_v62 = vadd.f32 %v198_v56, %v197_v51  ;;  %v151_v63 = vadd.f32 %v150_v52, %v149_v48  ;;  %v152_v40 = vadd.f32 %v136_v58, %v133_v59 }
 0x11f   :  { %v344_v4 = vrot.slane %v343_v61, 2 }
 0x120   :  { %v294_v3 = vrot.slane %v293_v60, 1  ;;  %v200_v6 = vrot.slane %v199_v62, 2  ;;  %v280_v7 = vpop.xlane.xlu1 %279  ;;  %v1138_v14 = vmul.f32 0.0009765625, %v151_v63 }
 0x121   :  { %v277_v8 = vpop.xlane.xlu0 %276  ;;  %v345_v11 = vadd.f32 %v344_v4, %v343_v61 }
 0x122   :  { %v295_v10 = vadd.f32 %v294_v3, %v293_v60  ;;  %v201_v12 = vadd.f32 %v200_v6, %v199_v62  ;;  %v215_v26 = vmul.f32 %v1138_v14, %v1138_v14  ;;  %v296_v46 = vadd.f32 %v280_v7, %v277_v8  ;;  %v1154_v8 = vld [vmem:[#allocation8] sm:$0xff] }
 0x123   :  { %v346_v16 = vrot.slane %v345_v11, 1  ;;  %v223_v52 = vsub.f32 %v1022_v1, %v1138_v14  ;;  %v224_v54 = vsub.f32 %v1030_v5, %v1138_v14  ;;  %v225_v55 = vsub.f32 %v1038_v9, %v1138_v14 }
 0x124   :  { %v305_v15 = vmul.f32 0.0009765625, %v295_v10  ;;  %v202_v17 = vrot.slane %v201_v12, 1  ;;  %v185_v18 = vpop.xlane.xlu1 %184  ;;  %v226_v56 = vsub.f32 %v1058_v21, %v1138_v14  ;;  %v1156_v21 = vld [vmem:[#allocation8 + $0x8] sm:$0xff] }
 0x125   :  { %v139_v19 = vpop.xlane.xlu0 %138  ;;  %v347_v20 = vadd.f32 %v346_v16, %v345_v11 }
 0x126   :  { %v203_v22 = vadd.f32 %v202_v17, %v201_v12  ;;  %v359_v24 = vmul.f32 %v305_v15, %v305_v15  ;;  %v153_v42 = vadd.f32 %v152_v40, %v139_v19  ;;  %v367_v62 = vsub.f32 %v1020_v0, %v305_v15  ;;  %v1160_v19 = vld [vmem:[#allocation7 + $0x8] sm:$0xff] }
 0x127   :  { %v357_v23 = vmul.f32 0.0009765625, %v347_v20  ;;  %v368_v63 = vsub.f32 %v1024_v2, %v305_v15  ;;  %v369_v3 = vsub.f32 %v1045_v13, %v305_v15  ;;  %v370_v1 = vsub.f32 %v1065_v25, %v305_v15  ;;  %v1158_v15 = vld [vmem:[#allocation7] sm:$0xff]  ;;  %v1162_v20 = vld [vmem:[#allocation8 + $0x10] sm:$0xff] }
 0x128   :  { %v213_v27 = vmul.f32 0.0009765625, %v203_v22  ;;  %v283_v28 = vpop.xlane.xlu1 %282 }
 0x129   :  { %v188_v29 = vpop.xlane.xlu0 %187  ;;  %v361_v30 = vsub.f32 %v357_v23, %v359_v24  ;;  %v297_v48 = vadd.f32 %v296_v46, %v283_v28  ;;  %v242_v46 = vld [vmem:[#allocation7 + $0x18] sm:$0xff] }
 0x12a   :  { %v217_v31 = vsub.f32 %v213_v27, %v215_v26  ;;  %v204_v58 = vadd.f32 %v188_v29, %v185_v18 }
 0x12b   :  { %v363_v34 = vadd.f32 1e-05, %v361_v30 }
 0x12c   :  { %v219_v35 = vadd.f32 1e-05, %v217_v31  ;;  %v332_v38 = vpop.xlane.xlu1 %331  ;;  %v1166_v31 = vld [vmem:[#allocation8 + $0x18] sm:$0xff] }
 0x12d   :  { %v329_v39 = vpop.xlane.xlu0 %328  ;;  %696 = vrsqrt.f32 %v363_v34 }
 0x12e   :  { %698 = vrsqrt.f32 %v219_v35  ;;  %v348_v59 = vadd.f32 %v332_v38, %v329_v39 }
 0x130   :  { %v191_v43 = vpop.xlane.xlu1 %190 }
 0x131   :  { %v142_v44 = vpop.xlane.xlu0 %141  ;;  %v205_v5 = vadd.f32 %v204_v58, %v191_v43 }
 0x132   :  { %v154_v47 = vadd.f32 %v153_v42, %v142_v44  ;;  %v241_v44 = vld [vmem:[#allocation7 + $0x10] sm:$0xff] }
 0x134   :  { %v155_v49 = vrot.slane %v154_v47, 4  ;;  %v335_v50 = vpop.xlane.xlu1 %334 }
 0x135   :  { %v286_v51 = vpop.xlane.xlu0 %285  ;;  %v349_v7 = vadd.f32 %v348_v59, %v335_v50 }
 0x136   :  { %v156_v60 = vadd.f32 %v155_v49, %v154_v47  ;;  %v298_v61 = vadd.f32 %v297_v48, %v286_v51 }
 0x137   :  { %v697_v4 = vpop.eup %696 }
 0x138   :  { %v157_v6 = vrot.slane %v156_v60, 2  ;;  %v299_v9 = vrot.slane %v298_v61, 4  ;;  %v699_v10 = vpop.eup %698  ;;  %v338_v11 = vpop.xlane.xlu1 %337  ;;  %v375_v14 = vmul.f32 %v697_v4, %v367_v62  ;;  %v376_v0 = vmul.f32 %v697_v4, %v368_v63 }
 0x139   :  { %v194_v12 = vpop.xlane.xlu0 %193  ;;  %v377_v16 = vmul.f32 %v697_v4, %v369_v3  ;;  %v378_v2 = vmul.f32 %v697_v4, %v370_v1  ;;  %v350_v18 = vadd.f32 %v349_v7, %v338_v11  ;;  %v231_v24 = vmul.f32 %v699_v10, %v223_v52 }
 0x13a   :  { %v158_v17 = vadd.f32 %v157_v6, %v156_v60  ;;  %v300_v13 = vadd.f32 %v299_v9, %v298_v61  ;;  %v206_v25 = vadd.f32 %v205_v5, %v194_v12  ;;  %v387_v22 = vmul.f32 %v1154_v8, %v375_v14 }
 0x13b   :  { %v388_v23 = vmul.f32 %v1156_v21, %v376_v0  ;;  %v232_v26 = vmul.f32 %v699_v10, %v224_v54  ;;  %v351_v29 = vrot.slane %v350_v18, 4  ;;  %v243_v35 = vmul.f32 %v1158_v15, %v231_v24 }
 0x13c   :  { %v159_v27 = vrot.slane %v158_v17, 1  ;;  %v301_v28 = vrot.slane %v300_v13, 2  ;;  %v207_v30 = vrot.slane %v206_v25, 4  ;;  %v389_v39 = vmul.f32 %v1162_v20, %v377_v16 }
 0x13d   :  { %v395_v34 = vpack.c.bf16 %v388_v23, %v387_v22  ;;  %v244_v38 = vmul.f32 %v1160_v19, %v232_v26  ;;  %v352_v42 = vadd.f32 %v351_v29, %v350_v18  ;;  %v390_v48 = vmul.f32 %v1166_v31, %v378_v2 }
 0x13e   :  { %v302_v40 = vadd.f32 %v301_v28, %v300_v13  ;;  %v208_v43 = vadd.f32 %v207_v30, %v206_v25  ;;  %v233_v49 = vmul.f32 %v699_v10, %v225_v55  ;;  %v234_v50 = vmul.f32 %v699_v10, %v226_v56 }
 0x13f   :  { %653 = vmatprep.mubr.msk.bf16.mxu1 %vm118_vm0, %v395_v34  ;;  %v251_v47 = vpack.c.bf16 %v244_v38, %v243_v35  ;;  %v160_v51 = vadd.f32 %v159_v27, %v158_v17  ;;  %v353_v54 = vrot.slane %v352_v42, 2  ;;  %v396_v59 = vpack.c.bf16 %v390_v48, %v389_v39 }
 0x140   :  { %v303_v52 = vrot.slane %v302_v40, 1  ;;  %v209_v58 = vrot.slane %v208_v43, 2  ;;  %v245_v60 = vmul.f32 %v241_v44, %v233_v49  ;;  %v246_v61 = vmul.f32 %v242_v46, %v234_v50 }
 0x141   :  { %665 = vmatprep.mubr.msk.bf16.mxu0 %vm118_vm0, %v251_v47  ;;  %v354_v63 = vadd.f32 %v353_v54, %v352_v42  ;;  %654 = vmatmul.mubr.msk.bf16.vlgmr.msra.gmra.mrb[0].mxu1 %vm118_vm0, %v396_v59  ;;  %v162_v4 = vmul.f32 0.0009765625, %v160_v51  ;;  %v588_v54 = vld [vmem:[#allocation11 + $0x18] sm:$0xff] }
 0x142   :  { %v304_v62 = vadd.f32 %v303_v52, %v302_v40  ;;  %v210_v3 = vadd.f32 %v209_v58, %v208_v43  ;;  %v252_v1 = vpack.c.bf16 %v246_v61, %v245_v60  ;;  %v586_v61 = vld [vmem:[#allocation11 + $0x8] sm:$0xff] }
 0x143   :  { %v355_v6 = vrot.slane %v354_v63, 1  ;;  %v216_v11 = vmul.f32 %v162_v4, %v162_v4  ;;  %v227_v23 = vsub.f32 %v1078_v33, %v162_v4  ;;  %v228_v24 = vsub.f32 %v1076_v32, %v162_v4 }
 0x144   :  { %v306_v5 = vmul.f32 0.0009765625, %v304_v62  ;;  %v211_v55 = vrot.slane %v210_v3, 1  ;;  %666 = vmatmul.mubr.msk.bf16.vlgmr.msra.gmra.mrb[0].mxu0 %vm118_vm0, %v252_v1  ;;  %v229_v26 = vsub.f32 %v1094_v41, %v162_v4  ;;  %v230_v27 = vsub.f32 %v1114_v53, %v162_v4 }
 0x145   :  { %v356_v56 = vadd.f32 %v355_v6, %v354_v63 }
 0x146   :  { %v212_v7 = vadd.f32 %v211_v55, %v210_v3  ;;  %v360_v10 = vmul.f32 %v306_v5, %v306_v5  ;;  %v371_v17 = vsub.f32 %v1086_v37, %v306_v5  ;;  %v372_v13 = vsub.f32 %v1084_v36, %v306_v5 }
 0x147   :  { %v358_v9 = vmul.f32 0.0009765625, %v356_v56  ;;  %v373_v18 = vsub.f32 %v1101_v45, %v306_v5  ;;  %v374_v25 = vsub.f32 %v1121_v57, %v306_v5 }
 0x148   :  { %v214_v12 = vmul.f32 0.0009765625, %v212_v7 }
 0x149   :  { %v362_v14 = vsub.f32 %v358_v9, %v360_v10 }
 0x14a   :  { %v218_v0 = vsub.f32 %v214_v12, %v216_v11 }
 0x14b   :  { %v364_v16 = vadd.f32 1e-05, %v362_v14 }
 0x14c   :  { %v220_v2 = vadd.f32 1e-05, %v218_v0 }
 0x14d   :  { %700 = vrsqrt.f32 %v364_v16 }
 0x14e   :  { %702 = vrsqrt.f32 %v220_v2 }
 0x157   :  { %v701_v22 = vpop.eup %700 }
 0x158   :  { %v703_v28 = vpop.eup %702  ;;  %v379_v29 = vmul.f32 %v701_v22, %v371_v17  ;;  %v380_v30 = vmul.f32 %v701_v22, %v372_v13  ;;  %v381_v34 = vmul.f32 %v701_v22, %v373_v18  ;;  %v382_v37 = vmul.f32 %v701_v22, %v374_v25 }
 0x159   :  { %v235_v35 = vmul.f32 %v703_v28, %v227_v23  ;;  %v236_v36 = vmul.f32 %v703_v28, %v228_v24  ;;  %v237_v38 = vmul.f32 %v703_v28, %v229_v26  ;;  %v238_v45 = vmul.f32 %v703_v28, %v230_v27 }
 0x15a   :  { %v391_v57 = vmul.f32 %v1154_v8, %v379_v29  ;;  %v392_v39 = vmul.f32 %v1156_v21, %v380_v30  ;;  %v393_v33 = vmul.f32 %v1162_v20, %v381_v34  ;;  %v394_v32 = vmul.f32 %v1166_v31, %v382_v37 }
 0x15b   :  { %v247_v41 = vmul.f32 %v1158_v15, %v235_v35  ;;  %v248_v53 = vmul.f32 %v1160_v19, %v236_v36  ;;  %v249_v40 = vmul.f32 %v241_v44, %v237_v38  ;;  %v250_v42 = vmul.f32 %v242_v46, %v238_v45  ;;  %v587_v15 = vld [vmem:[#allocation11 + $0x10] sm:$0xff]  ;;  %v585_v46 = vld [vmem:[#allocation11] sm:$0xff] }
 0x15c   :  { %v397_v43 = vpack.c.bf16 %v392_v39, %v391_v57  ;;  %v398_v47 = vpack.c.bf16 %v394_v32, %v393_v33 }
 0x15d   :  { %v253_v48 = vpack.c.bf16 %v248_v53, %v247_v41  ;;  %v254_v49 = vpack.c.bf16 %v250_v42, %v249_v40 }
 0x15e   :  { %657 = vmatprep.mubr.msk.bf16.mxu1 %vm118_vm0, %v397_v43 }
 0x15f   :  { %669 = vmatprep.mubr.msk.bf16.mxu0 %vm118_vm0, %v253_v48  ;;  %658 = vmatmul.mubr.msk.bf16.gmra.mrb[4].mxu1 %vm118_vm0, %v398_v47 }
 0x160   :  { %670 = vmatmul.mubr.msk.bf16.gmra.mrb[4].mxu0 %vm118_vm0, %v254_v49 }
 0x214   :  { %v655_v8 = vpop.f32.mrb[0].mxu1 }
 0x215   :  { %v465_v21 = vpop.f32.mrb[1].mxu1 }
 0x216   :  { %v656_v31 = vpop.f32.mrb[2].mxu1 }
 0x217   :  { %v667_v20 = vpop.f32.mrb[0].mxu0  ;;  %v468_v50 = vpop.f32.mrb[3].mxu1 }
 0x218   :  { %v563_v19 = vadd.f32 %v667_v20, %v655_v8  ;;  %v554_v44 = vpop.f32.mrb[1].mxu0 }
 0x219   :  { %v555_v51 = vadd.f32 %v554_v44, %v465_v21  ;;  %v668_v52 = vpop.f32.mrb[2].mxu0 }
 0x21a   :  { %v591_v58 = vadd.f32 %v587_v15, %v563_v19  ;;  %v566_v59 = vadd.f32 %v668_v52, %v656_v31  ;;  %v557_v60 = vpop.f32.mrb[3].mxu0 }
 0x21b   :  { %v589_v62 = vadd.f32 %v585_v46, %v555_v51  ;;  %v558_v63 = vadd.f32 %v557_v60, %v468_v50 }
 0x21c   :  { %599 = vst.msk [vmem:[#allocation13 + $0x10] sm:$0xff] %vm118_vm0, %v591_v58  ;;  %v592_v3 = vadd.f32 %v588_v54, %v566_v59 }
 0x21d   :  { %597 = vst.msk [vmem:[#allocation13] sm:$0xff] %vm118_vm0, %v589_v62  ;;  %v590_v1 = vadd.f32 %v586_v61, %v558_v63 }
 0x21e   :  { %600 = vst.msk [vmem:[#allocation13 + $0x18] sm:$0xff] %vm118_vm0, %v592_v3 }
 0x21f   :  { %598 = vst.msk [vmem:[#allocation13 + $0x8] sm:$0xff] %vm118_vm0, %v590_v1 }
 0x232   :  { %v659_v4 = vpop.f32.mrb[4].mxu1 }
 0x233   :  { %v671_v5 = vpop.f32.mrb[4].mxu0  ;;  %v481_v6 = vpop.f32.mrb[5].mxu1 }
 0x234   :  { %v579_v55 = vadd.f32 %v671_v5, %v659_v4  ;;  %v570_v56 = vpop.f32.mrb[5].mxu0  ;;  %v660_v7 = vpop.f32.mrb[6].mxu1 }
 0x235   :  { %v571_v9 = vadd.f32 %v570_v56, %v481_v6  ;;  %v672_v10 = vpop.f32.mrb[6].mxu0  ;;  %v484_v11 = vpop.f32.mrb[7].mxu1 }
 0x236   :  { %v595_v12 = vadd.f32 %v587_v15, %v579_v55  ;;  %v582_v14 = vadd.f32 %v672_v10, %v660_v7  ;;  %v573_v0 = vpop.f32.mrb[7].mxu0 }
 0x237   :  { %v593_v16 = vadd.f32 %v585_v46, %v571_v9  ;;  %v574_v2 = vadd.f32 %v573_v0, %v484_v11 }
 0x238   :  { %603 = vst.msk [vmem:[#allocation13 + $0x30] sm:$0xff] %vm118_vm0, %v595_v12  ;;  %v596_v17 = vadd.f32 %v588_v54, %v582_v14 }
 0x239   :  { %601 = vst.msk [vmem:[#allocation13 + $0x20] sm:$0xff] %vm118_vm0, %v593_v16  ;;  %v594_v13 = vadd.f32 %v586_v61, %v574_v2 }
 0x23a   :  { %604 = vst.msk [vmem:[#allocation13 + $0x38] sm:$0xff] %vm118_vm0, %v596_v17 }
 0x23b   :  { %602 = vst.msk [vmem:[#allocation13 + $0x28] sm:$0xff] %vm118_vm0, %v594_v13 }
 0x23c   :  { %847 = shalt.err (!%p844_p10)
}
 0x23d   :  { %s848_s12 = scalar_lea.hbm %s1224_s7, 1024 }
 0x23e   :  { %p849_p11 = scmp.ne.s32.totalorder %s1224_s7, %s848_s12  ;;  %p852_p12 = scmp.lt.u32.totalorder %s848_s12, %s1224_s7 }
 0x240   :  { %p854_p13 = pnand %p852_p12, %p849_p11 }
 0x242   :  { %857 = shalt.err (!%p854_p13)
}
 0x243   :  { %616 = dma.vmem_to_hbm [thread:$0]  %s611_s8, 1024, %s1224_s7, [#allocation4], %s870_s13, %s870_s13, %s871_s14  }
 0x244   :  { %866 = dma.done.wait [#allocation4], 1024  }
 0x245   :  { %867 = vsyncadd [#allocation4], 4294966272 }
 0x246   :  { %620 = vsyncpa [#allocation3], 1 }
 0x247   :  { %621 = vsyncpa [#allocation6], 1 }
 0x248   :  { %622 = vsyncpa [#allocation9], 1 }
 0x249   :  { %623 = vsyncpa [#allocation12], 1 }
 0x24a   :  { %624 = vsyncpa [#allocation4], 1 }

</bundles_post_ra>
